<compile_context>
chip_gen: v6e
topology: v6e:2x2x1
jax: 0.10.0
libtpu: 0.0.40
codegen_flags: <defaults>
</compile_context>

<pallas_src>
import functools

import jax
import jax.numpy as jnp
from jax.experimental import pallas as pl
from jax.experimental.pallas import tpu as pltpu


def _round_up(x, m):
    return ((x + m - 1) // m) * m


def _cdiv(a, b):
    return (a + b - 1) // b


def _pick_hidden_chunk(hidden):
    """Hidden-chunk width: lane-aligned (multiple of 128), <= 512, divides hidden."""
    if hidden % 128 != 0:
        return hidden
    for cand in (512, 384, 256, 128):
        if hidden % cand == 0:
            return cand
    return hidden


def _vmem_budget_bytes():
    """Physical VMEM minus headroom for compiler-internal scratch."""
    try:
        cap = pltpu.get_tpu_info().vmem_capacity_bytes
    except Exception:
        cap = 64 * 1024 * 1024  # conservative fallback (v7x per-TC size)
    return int(cap * 0.85)


def _gelu_f32(x, approximate):
    if approximate:
        # tanh form (PyTorch nn.GELU(approximate='tanh')): exp/tanh land on the
        # EUP slot and co-issue with MXU work nearly for free on v6e/v7x.
        c = jnp.float32(0.7978845608028654)  # sqrt(2/pi)
        return 0.5 * x * (1.0 + jnp.tanh(c * (x + jnp.float32(0.044715) * x * x * x)))
    # Exact erf form: matches PyTorch nn.GELU() default.
    return 0.5 * x * (1.0 + jax.scipy.special.erf(x * jnp.float32(0.7071067811865476)))


def _ff_kernel(x_ref, w1_ref, b1_ref, w2_ref, b2_ref, o_ref, acc_ref,
               *, n_chunks, approximate_gelu):
    # x_ref : (TM, dim)
    # w1_ref: (C, dim, hk)   b1_ref: (C, 1, hk)
    # w2_ref: (C, hk, dim)   b2_ref: (1, dim)
    # o_ref : (TM, dim)      acc_ref: (TM, dim) f32 scratch
    j = pl.program_id(1)

    @pl.when(j == 0)
    def _():
        acc_ref[...] = jnp.zeros_like(acc_ref)

    # Cast once to the weight dtype so bf16 weights hit the bf16 MXU path.
    x = x_ref[...].astype(w1_ref.dtype)

    def chunk(c, carry):
        # matmul1 chunk -> bias + GELU (f32) -> partial matmul2 into accumulator.
        h = jnp.dot(x, w1_ref[c], preferred_element_type=jnp.float32)
        h = h + b1_ref[c].astype(jnp.float32)
        g = _gelu_f32(h, approximate_gelu)
        acc_ref[...] += jnp.dot(g.astype(w2_ref.dtype), w2_ref[c],
                                preferred_element_type=jnp.float32)
        return carry

    if n_chunks == 1:
        chunk(0, 0)
    else:
        jax.lax.fori_loop(0, n_chunks, chunk, 0, unroll=n_chunks <= 8)

    @pl.when(j == pl.num_programs(1) - 1)
    def _():
        o_ref[...] = (acc_ref[...] + b2_ref[...].astype(jnp.float32)
                      ).astype(o_ref.dtype)


def feedforward(x, w1, b1, w2, b2, *, block_tokens=512, approximate_gelu=False):
    """ViT MLP forward.

    x:  (batch, seq, dim)
    w1: (dim, hidden), b1: (hidden,)   (transposed vs. torch nn.Linear.weight)
    w2: (hidden, dim), b2: (dim,)
    Pass bf16 weights to run the matmuls on the bf16 MXU (f32 accumulation).
    """
    batch, seq, dim = x.shape
    hidden = w1.shape[1]
    n = batch * seq

    x_item = jnp.dtype(x.dtype).itemsize
    w_item = jnp.dtype(w1.dtype).itemsize
    b_item = jnp.dtype(b1.dtype).itemsize

    # bf16 packs 16 rows per sublane tile -> 16-row alignment for 2-byte x.
    row_align = 16 if x_item < 4 else 8

    hk = _pick_hidden_chunk(hidden)
    n_hchunks = hidden // hk

    # ---- token tile ------------------------------------------------------
    tm = min(block_tokens, _round_up(n, row_align))
    # v7x megacore: prefer >= 2 token tiles so the "parallel" axis can be
    # split across both TensorCores (without inflating padding for tiny n).
    if _cdiv(n, tm) < 2 and n > 2 * row_align:
        tm = _round_up(_cdiv(n, 2), row_align)

    budget = _vmem_budget_bytes()

    def _estimate(tm_, resident_):
        fixed = (2 * tm_ * dim * x_item        # x tiles, double-buffered
                 + 2 * tm_ * dim * x_item      # out tiles, double-buffered
                 + tm_ * dim * 4               # f32 accumulator scratch
                 + 2 * tm_ * hk * 4            # h / GELU chunk intermediates
                 + dim * 4)                    # second bias
        if resident_:
            w_bytes = 2 * dim * hidden * w_item + hidden * b_item   # single-buffered
        else:
            w_bytes = 2 * (2 * dim * hk * w_item + hk * b_item)      # double-buffered slabs
        return int((fixed + w_bytes) * 1.3) + (1 << 20)

    # Shrink the token tile until a regime fits the VMEM budget; prefer
    # VMEM-resident weights (no per-token-tile weight re-streaming from HBM).
    resident = True
    while True:
        if _estimate(tm, True) <= budget:
            resident = True
            break
        if _estimate(tm, False) <= budget:
            resident = False
            break
        if tm <= row_align:
            resident = False
            break
        tm = max(row_align, _round_up(tm // 2, row_align))

    n_pad = _round_up(n, tm)
    grid_tokens = n_pad // tm

    # ---- operand prep (one-time layout plumbing, outside the kernel) ------
    x2d = x.reshape(n, dim)
    if n_pad != n:
        x2d = jnp.pad(x2d, ((0, n_pad - n), (0, 0)))
    # Chunked weight layout: leading axis indexes hidden chunks of width hk.
    w1c = w1.reshape(dim, n_hchunks, hk).transpose(1, 0, 2)   # (C, dim, hk)
    b1c = b1.reshape(n_hchunks, 1, hk)                        # (C, 1, hk)
    w2c = w2.reshape(n_hchunks, hk, dim)                      # (C, hk, dim)
    b2r = b2.reshape(1, dim)

    if resident:
        grid = (grid_tokens, 1)
        n_chunks = n_hchunks
    else:
        grid = (grid_tokens, n_hchunks)
        n_chunks = 1

    kernel = functools.partial(_ff_kernel, n_chunks=n_chunks,
                               approximate_gelu=approximate_gelu)

    def _weight_specs(single_buffer):
        if resident:
            mode = pl.Buffered(1) if single_buffer else None

            def spec(shape, imap):
                if mode is None:
                    return pl.BlockSpec(shape, imap)
                return pl.BlockSpec(shape, imap, pipeline_mode=mode)

            # Constant index_map -> VMEM-resident; Buffered(1) -> single buffer.
            return [
                spec((n_hchunks, dim, hk), lambda i, j: (0, 0, 0)),
                spec((n_hchunks, 1, hk), lambda i, j: (0, 0, 0)),
                spec((n_hchunks, hk, dim), lambda i, j: (0, 0, 0)),
                spec((1, dim), lambda i, j: (0, 0)),
            ]
        # Streamed weight slabs over the trailing "arbitrary" hidden axis.
        return [
            pl.BlockSpec((1, dim, hk), lambda i, j: (j, 0, 0)),
            pl.BlockSpec((1, 1, hk), lambda i, j: (j, 0, 0)),
            pl.BlockSpec((1, hk, dim), lambda i, j: (j, 0, 0)),
            pl.BlockSpec((1, dim), lambda i, j: (0, 0)),
        ]

    def _call(single_buffer_weights):
        return pl.pallas_call(
            kernel,
            out_shape=jax.ShapeDtypeStruct((n_pad, dim), x.dtype),
            grid_spec=pl.GridSpec(
                grid=grid,
                in_specs=[pl.BlockSpec((tm, dim), lambda i, j: (i, 0))]
                         + _weight_specs(single_buffer_weights),
                out_specs=pl.BlockSpec((tm, dim), lambda i, j: (i, 0)),
                scratch_shapes=[pltpu.VMEM((tm, dim), jnp.float32)],
            ),
            compiler_params=pltpu.CompilerParams(
                dimension_semantics=("parallel", "arbitrary"),
                vmem_limit_bytes=budget,
            ),
        )(x2d, w1c, b1c, w2c, b2r)

    if resident:
        try:
            out2d = _call(True)
        except Exception:
            # pipeline_mode / Buffered(1) support varies across jax versions;
            # fall back to default double-buffered weights (correct, more VMEM).
            out2d = _call(False)
    else:
        out2d = _call(False)

    if n_pad != n:
        out2d = out2d[:n]
    return out2d.reshape(batch, seq, dim)


def reference(x, w1, b1, w2, b2):
    h = x @ w1 + b1
    g = 0.5 * h * (1.0 + jax.scipy.special.erf(h / jnp.sqrt(2.0)))
    return g @ w2 + b2


if __name__ == "__main__":
    # Small ViT-like shapes: batch=2, seq=8 tokens, dim=32, hidden=64.
    batch, seq, dim, hidden = 2, 8, 32, 64

    key = jax.random.PRNGKey(0)
    kx, kw1, kb1, kw2, kb2 = jax.random.split(key, 5)

    x = jax.random.normal(kx, (batch, seq, dim), dtype=jnp.float32)
    # Deterministic synthetic parameters (PyTorch-equivalent shapes, stored
    # transposed as (in, out)).
    w1 = jax.random.normal(kw1, (dim, hidden), dtype=jnp.float32) * 0.02
    b1 = jax.random.normal(kb1, (hidden,), dtype=jnp.float32) * 0.02
    w2 = jax.random.normal(kw2, (hidden, dim), dtype=jnp.float32) * 0.02
    b2 = jax.random.normal(kb2, (dim,), dtype=jnp.float32) * 0.02

    ref = reference(x, w1, b1, w2, b2)

    # f32 path: exact-erf GELU, tight parity with the PyTorch module.
    out = jax.block_until_ready(feedforward(x, w1, b1, w2, b2))
    assert out.shape == (batch, seq, dim)
    assert jnp.allclose(out, ref, atol=1e-5, rtol=1e-5), "f32 mismatch vs reference"

    # bf16-weight path: exercises the bf16 MXU route (f32 accumulation);
    # loose tolerance by design (documented deviation from the f32 reference).
    out_bf16 = jax.block_until_ready(
        feedforward(x,
                    w1.astype(jnp.bfloat16), b1.astype(jnp.bfloat16),
                    w2.astype(jnp.bfloat16), b2.astype(jnp.bfloat16)))
    assert out_bf16.shape == (batch, seq, dim)
    assert jnp.allclose(out_bf16, ref, atol=3e-2, rtol=3e-2), "bf16 mismatch vs reference"

    print("KERNEL_OK")
</pallas_src>

<mosaic_0001>
module attributes {stable_mosaic.version = 11 : i64} {
  func.func @_ff_kernel(%arg0: i32, %arg1: i32, %arg2: memref<16x32xf32, #tpu.memory_space<vmem>>, %arg3: memref<1x32x64xf32, #tpu.memory_space<vmem>>, %arg4: memref<1x1x64xf32, #tpu.memory_space<vmem>>, %arg5: memref<1x64x32xf32, #tpu.memory_space<vmem>>, %arg6: memref<1x32xf32, #tpu.memory_space<vmem>>, %arg7: memref<16x32xf32, #tpu.memory_space<vmem>>, %arg8: memref<16x32xf32, #tpu.memory_space<vmem>>) attributes {dimension_semantics = [#tpu.dimension_semantics<parallel>, #tpu.dimension_semantics<arbitrary>], iteration_bounds = array<i64: 1, 1>, scalar_prefetch = 0 : i64, scratch_operands = 1 : i64, tpu.core_type = #tpu.core_type<tc>, window_params = [{transform_indices = @transform_0, window_bounds = array<i64: 16, 32>}, {pipeline_mode = #tpu.pipeline_mode<synchronous>, transform_indices = @transform_1, window_bounds = array<i64: 1, 32, 64>}, {pipeline_mode = #tpu.pipeline_mode<synchronous>, transform_indices = @transform_2, window_bounds = array<i64: 1, 1, 64>}, {pipeline_mode = #tpu.pipeline_mode<synchronous>, transform_indices = @transform_3, window_bounds = array<i64: 1, 64, 32>}, {pipeline_mode = #tpu.pipeline_mode<synchronous>, transform_indices = @transform_4, window_bounds = array<i64: 1, 32>}, {transform_indices = @transform_5, window_bounds = array<i64: 16, 32>}]} {
    %c0_i32 = arith.constant 0 : i32
    %0 = arith.cmpi eq, %arg1, %c0_i32 : i32
    %1 = arith.extui %0 : i1 to i32
    %c0_i32_0 = arith.constant 0 : i32
    %2 = arith.cmpi ne, %1, %c0_i32_0 : i32
    scf.if %2 {
      %cst_21 = arith.constant 0.000000e+00 : f32
      %28 = vector.broadcast %cst_21 : f32 to vector<16x32xf32>
      %c0_22 = arith.constant 0 : index
      %c0_23 = arith.constant 0 : index
      %29 = vector.load %arg8[%c0_22, %c0_23] : memref<16x32xf32, #tpu.memory_space<vmem>>, vector<16x32xf32>
      tpu.vector_store %arg8[%c0_22, %c0_23], %28 {strides = array<i32>} : memref<16x32xf32, #tpu.memory_space<vmem>>, vector<16x32xf32>,
    } else {
    }
    %c0 = arith.constant 0 : index
    %c0_1 = arith.constant 0 : index
    %3 = vector.load %arg2[%c0, %c0_1] : memref<16x32xf32, #tpu.memory_space<vmem>>, vector<16x32xf32>
    %c0_2 = arith.constant 0 : index
    %c0_3 = arith.constant 0 : index
    %c0_4 = arith.constant 0 : index
    %4 = vector.load %arg3[%c0_2, %c0_3, %c0_4] : memref<1x32x64xf32, #tpu.memory_space<vmem>>, vector<1x32x64xf32>
    %5 = vector.shape_cast %4 : vector<1x32x64xf32> to vector<32x64xf32>
    %cst = arith.constant dense<0.000000e+00> : vector<16x64xf32>
    %6 = tpu.matmul %3, %5, %cst {dimension_numbers = #tpu.dot_dimension_numbers<[1], [0], [0], [1], [0, 0, 1, 1], [], []>} : vector<16x32xf32>, vector<32x64xf32>, vector<16x64xf32> -> vector<16x64xf32>
    %c0_5 = arith.constant 0 : index
    %c0_6 = arith.constant 0 : index
    %c0_7 = arith.constant 0 : index
    %7 = vector.load %arg4[%c0_5, %c0_6, %c0_7] : memref<1x1x64xf32, #tpu.memory_space<vmem>>, vector<1x1x64xf32>
    %8 = vector.shape_cast %7 : vector<1x1x64xf32> to vector<1x64xf32>
    %9 = vector.broadcast %8 : vector<1x64xf32> to vector<16x64xf32>
    %10 = arith.addf %6, %9 : vector<16x64xf32>
    %cst_8 = arith.constant 5.000000e-01 : f32
    %11 = vector.broadcast %cst_8 : f32 to vector<16x64xf32>
    %12 = arith.mulf %11, %10 : vector<16x64xf32>
    %cst_9 = arith.constant 0.707106769 : f32
    %13 = vector.broadcast %cst_9 : f32 to vector<16x64xf32>
    %14 = arith.mulf %10, %13 : vector<16x64xf32>
    %15 = math.erf %14 : vector<16x64xf32>
    %cst_10 = arith.constant 1.000000e+00 : f32
    %16 = vector.broadcast %cst_10 : f32 to vector<16x64xf32>
    %17 = arith.addf %16, %15 : vector<16x64xf32>
    %18 = arith.mulf %12, %17 : vector<16x64xf32>
    %c0_11 = arith.constant 0 : index
    %c0_12 = arith.constant 0 : index
    %19 = vector.load %arg8[%c0_11, %c0_12] : memref<16x32xf32, #tpu.memory_space<vmem>>, vector<16x32xf32>
    %c0_13 = arith.constant 0 : index
    %c0_14 = arith.constant 0 : index
    %c0_15 = arith.constant 0 : index
    %20 = vector.load %arg5[%c0_13, %c0_14, %c0_15] : memref<1x64x32xf32, #tpu.memory_space<vmem>>, vector<1x64x32xf32>
    %21 = vector.shape_cast %20 : vector<1x64x32xf32> to vector<64x32xf32>
    %cst_16 = arith.constant dense<0.000000e+00> : vector<16x32xf32>
    %22 = tpu.matmul %18, %21, %cst_16 {dimension_numbers = #tpu.dot_dimension_numbers<[1], [0], [0], [1], [0, 0, 1, 1], [], []>} : vector<16x64xf32>, vector<64x32xf32>, vector<16x32xf32> -> vector<16x32xf32>
    %23 = arith.addf %19, %22 : vector<16x32xf32>
    %c0_17 = arith.constant 0 : index
    %c0_18 = arith.constant 0 : index
    %24 = vector.load %arg8[%c0_17, %c0_18] : memref<16x32xf32, #tpu.memory_space<vmem>>, vector<16x32xf32>
    tpu.vector_store %arg8[%c0_17, %c0_18], %23 {strides = array<i32>} : memref<16x32xf32, #tpu.memory_space<vmem>>, vector<16x32xf32>,
    %c0_i32_19 = arith.constant 0 : i32
    %25 = arith.cmpi eq, %arg1, %c0_i32_19 : i32
    %26 = arith.extui %25 : i1 to i32
    %c0_i32_20 = arith.constant 0 : i32
    %27 = arith.cmpi ne, %26, %c0_i32_20 : i32
    scf.if %27 {
      %c0_21 = arith.constant 0 : index
      %c0_22 = arith.constant 0 : index
      %28 = vector.load %arg8[%c0_21, %c0_22] : memref<16x32xf32, #tpu.memory_space<vmem>>, vector<16x32xf32>
      %c0_23 = arith.constant 0 : index
      %c0_24 = arith.constant 0 : index
      %29 = vector.load %arg6[%c0_23, %c0_24] : memref<1x32xf32, #tpu.memory_space<vmem>>, vector<1x32xf32>
      %30 = vector.broadcast %29 : vector<1x32xf32> to vector<16x32xf32>
      %31 = arith.addf %28, %30 : vector<16x32xf32>
      %c0_25 = arith.constant 0 : index
      %c0_26 = arith.constant 0 : index
      %32 = vector.load %arg7[%c0_25, %c0_26] : memref<16x32xf32, #tpu.memory_space<vmem>>, vector<16x32xf32>
      tpu.vector_store %arg7[%c0_25, %c0_26], %31 {strides = array<i32>} : memref<16x32xf32, #tpu.memory_space<vmem>>, vector<16x32xf32>,
    } else {
    }
    return
  }
  func.func @transform_0(%arg0: i32, %arg1: i32) -> (i32, i32) {
    %c0_i32 = arith.constant 0 : i32
    %c0_i32_0 = arith.constant 0 : i32
    return %arg0, %c0_i32 : i32, i32
  }
  func.func @transform_1(%arg0: i32, %arg1: i32) -> (i32, i32, i32) {
    %c0_i32 = arith.constant 0 : i32
    %c0_i32_0 = arith.constant 0 : i32
    %c0_i32_1 = arith.constant 0 : i32
    %c0_i32_2 = arith.constant 0 : i32
    return %c0_i32, %c0_i32_0, %c0_i32_1 : i32, i32, i32
  }
  func.func @transform_2(%arg0: i32, %arg1: i32) -> (i32, i32, i32) {
    %c0_i32 = arith.constant 0 : i32
    %c0_i32_0 = arith.constant 0 : i32
    %c0_i32_1 = arith.constant 0 : i32
    %c0_i32_2 = arith.constant 0 : i32
    return %c0_i32, %c0_i32_0, %c0_i32_1 : i32, i32, i32
  }
  func.func @transform_3(%arg0: i32, %arg1: i32) -> (i32, i32, i32) {
    %c0_i32 = arith.constant 0 : i32
    %c0_i32_0 = arith.constant 0 : i32
    %c0_i32_1 = arith.constant 0 : i32
    %c0_i32_2 = arith.constant 0 : i32
    return %c0_i32, %c0_i32_0, %c0_i32_1 : i32, i32, i32
  }
  func.func @transform_4(%arg0: i32, %arg1: i32) -> (i32, i32) {
    %c0_i32 = arith.constant 0 : i32
    %c0_i32_0 = arith.constant 0 : i32
    %c0_i32_1 = arith.constant 0 : i32
    return %c0_i32, %c0_i32_0 : i32, i32
  }
  func.func @transform_5(%arg0: i32, %arg1: i32) -> (i32, i32) {
    %c0_i32 = arith.constant 0 : i32
    %c0_i32_0 = arith.constant 0 : i32
    return %arg0, %c0_i32 : i32, i32
  }
}

module attributes {stable_mosaic.version = 11 : i64} {
  func.func @_ff_kernel(%arg0: i32, %arg1: i32, %arg2: memref<16x32xf32, #tpu.memory_space<vmem>>, %arg3: memref<1x32x64xf32, #tpu.memory_space<vmem>>, %arg4: memref<1x1x64xf32, #tpu.memory_space<vmem>>, %arg5: memref<1x64x32xf32, #tpu.memory_space<vmem>>, %arg6: memref<1x32xf32, #tpu.memory_space<vmem>>, %arg7: memref<16x32xf32, #tpu.memory_space<vmem>>, %arg8: memref<16x32xf32, #tpu.memory_space<vmem>>) attributes {dimension_semantics = [#tpu.dimension_semantics<parallel>, #tpu.dimension_semantics<arbitrary>], iteration_bounds = array<i64: 1, 1>, scalar_prefetch = 0 : i64, scratch_operands = 1 : i64, tpu.core_type = #tpu.core_type<tc>, window_params = [{transform_indices = @transform_0, window_bounds = array<i64: 16, 32>}, {pipeline_mode = #tpu.pipeline_mode<synchronous>, transform_indices = @transform_1, window_bounds = array<i64: 1, 32, 64>}, {pipeline_mode = #tpu.pipeline_mode<synchronous>, transform_indices = @transform_2, window_bounds = array<i64: 1, 1, 64>}, {pipeline_mode = #tpu.pipeline_mode<synchronous>, transform_indices = @transform_3, window_bounds = array<i64: 1, 64, 32>}, {pipeline_mode = #tpu.pipeline_mode<synchronous>, transform_indices = @transform_4, window_bounds = array<i64: 1, 32>}, {transform_indices = @transform_5, window_bounds = array<i64: 16, 32>}]} {
    %c0_i32 = arith.constant 0 : i32
    %0 = arith.cmpi eq, %arg1, %c0_i32 : i32
    %1 = arith.extui %0 : i1 to i32
    %c0_i32_0 = arith.constant 0 : i32
    %2 = arith.cmpi ne, %1, %c0_i32_0 : i32
    scf.if %2 {
      %cst_21 = arith.constant 0.000000e+00 : f32
      %28 = vector.broadcast %cst_21 : f32 to vector<16x32xf32>
      %c0_22 = arith.constant 0 : index
      %c0_23 = arith.constant 0 : index
      %29 = vector.load %arg8[%c0_22, %c0_23] : memref<16x32xf32, #tpu.memory_space<vmem>>, vector<16x32xf32>
      tpu.vector_store %arg8[%c0_22, %c0_23], %28 {strides = array<i32>} : memref<16x32xf32, #tpu.memory_space<vmem>>, vector<16x32xf32>,
    } else {
    }
    %c0 = arith.constant 0 : index
    %c0_1 = arith.constant 0 : index
    %3 = vector.load %arg2[%c0, %c0_1] : memref<16x32xf32, #tpu.memory_space<vmem>>, vector<16x32xf32>
    %c0_2 = arith.constant 0 : index
    %c0_3 = arith.constant 0 : index
    %c0_4 = arith.constant 0 : index
    %4 = vector.load %arg3[%c0_2, %c0_3, %c0_4] : memref<1x32x64xf32, #tpu.memory_space<vmem>>, vector<1x32x64xf32>
    %5 = vector.shape_cast %4 : vector<1x32x64xf32> to vector<32x64xf32>
    %cst = arith.constant dense<0.000000e+00> : vector<16x64xf32>
    %6 = tpu.matmul %3, %5, %cst {dimension_numbers = #tpu.dot_dimension_numbers<[1], [0], [0], [1], [0, 0, 1, 1], [], []>} : vector<16x32xf32>, vector<32x64xf32>, vector<16x64xf32> -> vector<16x64xf32>
    %c0_5 = arith.constant 0 : index
    %c0_6 = arith.constant 0 : index
    %c0_7 = arith.constant 0 : index
    %7 = vector.load %arg4[%c0_5, %c0_6, %c0_7] : memref<1x1x64xf32, #tpu.memory_space<vmem>>, vector<1x1x64xf32>
    %8 = vector.shape_cast %7 : vector<1x1x64xf32> to vector<1x64xf32>
    %9 = vector.broadcast %8 : vector<1x64xf32> to vector<16x64xf32>
    %10 = arith.addf %6, %9 : vector<16x64xf32>
    %cst_8 = arith.constant 5.000000e-01 : f32
    %11 = vector.broadcast %cst_8 : f32 to vector<16x64xf32>
    %12 = arith.mulf %11, %10 : vector<16x64xf32>
    %cst_9 = arith.constant 0.707106769 : f32
    %13 = vector.broadcast %cst_9 : f32 to vector<16x64xf32>
    %14 = arith.mulf %10, %13 : vector<16x64xf32>
    %15 = math.erf %14 : vector<16x64xf32>
    %cst_10 = arith.constant 1.000000e+00 : f32
    %16 = vector.broadcast %cst_10 : f32 to vector<16x64xf32>
    %17 = arith.addf %16, %15 : vector<16x64xf32>
    %18 = arith.mulf %12, %17 : vector<16x64xf32>
    %c0_11 = arith.constant 0 : index
    %c0_12 = arith.constant 0 : index
    %19 = vector.load %arg8[%c0_11, %c0_12] : memref<16x32xf32, #tpu.memory_space<vmem>>, vector<16x32xf32>
    %c0_13 = arith.constant 0 : index
    %c0_14 = arith.constant 0 : index
    %c0_15 = arith.constant 0 : index
    %20 = vector.load %arg5[%c0_13, %c0_14, %c0_15] : memref<1x64x32xf32, #tpu.memory_space<vmem>>, vector<1x64x32xf32>
    %21 = vector.shape_cast %20 : vector<1x64x32xf32> to vector<64x32xf32>
    %cst_16 = arith.constant dense<0.000000e+00> : vector<16x32xf32>
    %22 = tpu.matmul %18, %21, %cst_16 {dimension_numbers = #tpu.dot_dimension_numbers<[1], [0], [0], [1], [0, 0, 1, 1], [], []>} : vector<16x64xf32>, vector<64x32xf32>, vector<16x32xf32> -> vector<16x32xf32>
    %23 = arith.addf %19, %22 : vector<16x32xf32>
    %c0_17 = arith.constant 0 : index
    %c0_18 = arith.constant 0 : index
    %24 = vector.load %arg8[%c0_17, %c0_18] : memref<16x32xf32, #tpu.memory_space<vmem>>, vector<16x32xf32>
    tpu.vector_store %arg8[%c0_17, %c0_18], %23 {strides = array<i32>} : memref<16x32xf32, #tpu.memory_space<vmem>>, vector<16x32xf32>,
    %c0_i32_19 = arith.constant 0 : i32
    %25 = arith.cmpi eq, %arg1, %c0_i32_19 : i32
    %26 = arith.extui %25 : i1 to i32
    %c0_i32_20 = arith.constant 0 : i32
    %27 = arith.cmpi ne, %26, %c0_i32_20 : i32
    scf.if %27 {
      %c0_21 = arith.constant 0 : index
      %c0_22 = arith.constant 0 : index
      %28 = vector.load %arg8[%c0_21, %c0_22] : memref<16x32xf32, #tpu.memory_space<vmem>>, vector<16x32xf32>
      %c0_23 = arith.constant 0 : index
      %c0_24 = arith.constant 0 : index
      %29 = vector.load %arg6[%c0_23, %c0_24] : memref<1x32xf32, #tpu.memory_space<vmem>>, vector<1x32xf32>
      %30 = vector.broadcast %29 : vector<1x32xf32> to vector<16x32xf32>
      %31 = arith.addf %28, %30 : vector<16x32xf32>
      %c0_25 = arith.constant 0 : index
      %c0_26 = arith.constant 0 : index
      %32 = vector.load %arg7[%c0_25, %c0_26] : memref<16x32xf32, #tpu.memory_space<vmem>>, vector<16x32xf32>
      tpu.vector_store %arg7[%c0_25, %c0_26], %31 {strides = array<i32>} : memref<16x32xf32, #tpu.memory_space<vmem>>, vector<16x32xf32>,
    } else {
    }
    return
  }
  func.func @transform_0(%arg0: i32, %arg1: i32) -> (i32, i32) {
    %c0_i32 = arith.constant 0 : i32
    %c0_i32_0 = arith.constant 0 : i32
    return %arg0, %c0_i32 : i32, i32
  }
  func.func @transform_1(%arg0: i32, %arg1: i32) -> (i32, i32, i32) {
    %c0_i32 = arith.constant 0 : i32
    %c0_i32_0 = arith.constant 0 : i32
    %c0_i32_1 = arith.constant 0 : i32
    %c0_i32_2 = arith.constant 0 : i32
    return %c0_i32, %c0_i32_0, %c0_i32_1 : i32, i32, i32
  }
  func.func @transform_2(%arg0: i32, %arg1: i32) -> (i32, i32, i32) {
    %c0_i32 = arith.constant 0 : i32
    %c0_i32_0 = arith.constant 0 : i32
    %c0_i32_1 = arith.constant 0 : i32
    %c0_i32_2 = arith.constant 0 : i32
    return %c0_i32, %c0_i32_0, %c0_i32_1 : i32, i32, i32
  }
  func.func @transform_3(%arg0: i32, %arg1: i32) -> (i32, i32, i32) {
    %c0_i32 = arith.constant 0 : i32
    %c0_i32_0 = arith.constant 0 : i32
    %c0_i32_1 = arith.constant 0 : i32
    %c0_i32_2 = arith.constant 0 : i32
    return %c0_i32, %c0_i32_0, %c0_i32_1 : i32, i32, i32
  }
  func.func @transform_4(%arg0: i32, %arg1: i32) -> (i32, i32) {
    %c0_i32 = arith.constant 0 : i32
    %c0_i32_0 = arith.constant 0 : i32
    %c0_i32_1 = arith.constant 0 : i32
    return %c0_i32, %c0_i32_0 : i32, i32
  }
  func.func @transform_5(%arg0: i32, %arg1: i32) -> (i32, i32) {
    %c0_i32 = arith.constant 0 : i32
    %c0_i32_0 = arith.constant 0 : i32
    return %arg0, %c0_i32 : i32, i32
  }
}

</mosaic_0001>

<bundles_post_ra>
// kernel: tpu_custom_call.1
= control target key start
LH: loop header
LB: loop body
LE: loop exit
PB: predicated region body
PF: predicated region fallthrough
CT: control target
= control target key end

     0   :  { %vm25_vm0 = vcmask 261120   ;;  %s436_s0 = inlined_call_operand.vmem [shape: f32[16,32], index: 0, kind: input, shape index: {}]   ;;  %s437_s1 = inlined_call_operand.vmem [shape: f32[1,32,64], index: 1, kind: input, shape index: {}]   ;;  %s438_s2 = inlined_call_operand.vmem [shape: f32[1,1,64], index: 2, kind: input, shape index: {}]   ;;  %s439_s3 = inlined_call_operand.vmem [shape: f32[1,64,32], index: 3, kind: input, shape index: {}]   ;;  %s440_s4 = inlined_call_operand.vmem [shape: f32[1,32], index: 4, kind: input, shape index: {}]   ;;  %s441_s5 = inlined_call_operand.hbm [shape: f32[16,32], index: 5, kind: output, shape index: {}]  }
   0x1   :  { %v33_v0 = vld [vmem:[%s437_s1 + $0x18] sm:$0xff]  ;;  %v32_v1 = vld [vmem:[%s437_s1 + $0x10] sm:$0xff]  ;;  %v28_v2 = vld [vmem:[%s436_s0] sm:$0xff] }
   0x2   :  { %283 = vmatprep.subr.mxu0 %v33_v0  ;;  %v31_v3 = vld [vmem:[%s437_s1 + $0x8] sm:$0xff]  ;;  %291 = vmatprep.mubr.msk.f32.mxu0 %vm25_vm0, %v28_v2 }
   0x3   :  { %284 = vmatpush3.msra.mxu0 %v33_v0 }
   0x4   :  { %10 = vsyncpa [#allocation4], 0  ;;  %285 = vmatprep.subr.mxu0 %v32_v1  ;;  %v30_v4 = vld [vmem:[%s437_s1] sm:$0xff]  ;;  %v29_v5 = vld [vmem:[%s436_s0 + $0x8] sm:$0xff]  ;;  %v343_v14 = vmov 0.0   ;;  %vm143_vm1 = vcmask 523264  }
   0x5   :  { %286 = vmatpush3.msra.mxu0 %v32_v1  ;;  %v142_v6 = vld [vmem:[%s439_s3 + $0x38] sm:$0xff]  ;;  %v141_v7 = vld [vmem:[%s439_s3 + $0x30] sm:$0xff]  ;;  %v140_v8 = vld [vmem:[%s439_s3 + $0x28] sm:$0xff]  ;;  %27 = vst.msk [vmem:[#allocation2 + $0x8] sm:$0xff] %vm25_vm0, %v343_v14  ;;  %s344_s21 = smov [#allocation3]  }
   0x6   :  { %287 = vmatprep.subr.mxu0 %v31_v3  ;;  %294 = vmatprep.subr.mxu1 %v142_v6  ;;  %v139_v9 = vld [vmem:[%s439_s3 + $0x20] sm:$0xff]  ;;  %v138_v10 = vld [vmem:[%s439_s3 + $0x18] sm:$0xff]  ;;  %v137_v11 = vld [vmem:[%s439_s3 + $0x10] sm:$0xff]  ;;  %26 = vst.msk [vmem:[#allocation2] sm:$0xff] %vm25_vm0, %v343_v14  ;;  %s250_s22 = sshll.u32 %s344_s21, 4  ;;  %s251_s22 = int_to_ptr.vmem [resolvable:$true] %s250_s22 }
   0x7   :  { %288 = vmatpush3.msra.mxu0 %v31_v3  ;;  %295 = vmatpush3.msra.mxu1 %v142_v6  ;;  %v136_v12 = vld [vmem:[%s439_s3 + $0x8] sm:$0xff]  ;;  %v135_v13 = vld [vmem:[%s439_s3] sm:$0xff]  ;;  %s321_s23 = scalar_lea.vmem %s251_s22, 256  ;;  %p326_p1 = scmp.lt.s32.totalorder %s251_s22, %s251_s22 }
   0x8   :  { %289 = vmatprep.subr.mxu0 %v30_v4  ;;  %296 = vmatprep.subr.mxu1 %v141_v7  ;;  %v261_v15 = vld [vmem:[%s438_s2] ss:$0 sm:$0xff]  ;;  %p322_p0 = scmp.ne.s32.totalorder %s251_s22, %s321_s23  ;;  %p327_p2 = scmp.lt.s32.totalorder %s321_s23, %s321_s23 }
   0x9   :  { %290 = vmatpush3.msra.mxu0 %v30_v4  ;;  %297 = vmatpush3.msra.mxu1 %v141_v7  ;;  %v266_v36 = vld [vmem:[%s440_s4] ss:$0 sm:$0xff] }
   0xa   :  { %292 = vmatmul.mubr.msk.f32.vlgmr.msra.gmra.mxu0 %vm25_vm0, %v29_v5  ;;  %298 = vmatprep.subr.mxu1 %v140_v8  ;;  %p328_p3 = por %p327_p2, %p326_p1 }
   0xb   :  { %299 = vmatpush3.msra.mxu1 %v140_v8 }
   0xc   :  { %300 = vmatprep.subr.mxu1 %v139_v9  ;;  %v134_v30 = vld [vmem:[#allocation2 + $0x8] sm:$0xff]  ;;  %p329_p4 = pnand %p328_p3, %p322_p0 }
   0xd   :  { %301 = vmatpush3.msra.mxu1 %v139_v9  ;;  %v133_v32 = vld [vmem:[#allocation2] sm:$0xff] }
   0xe   :  { %302 = vmatprep.subr.mxu1 %v138_v10 }
   0xf   :  { %303 = vmatpush3.msra.mxu1 %v138_v10 }
  0x10   :  { %304 = vmatprep.subr.mxu1 %v137_v11 }
  0x11   :  { %305 = vmatpush3.msra.mxu1 %v137_v11 }
  0x12   :  { %306 = vmatprep.subr.mxu1 %v136_v12 }
  0x13   :  { %307 = vmatpush3.msra.mxu1 %v136_v12 }
  0x14   :  { %308 = vmatprep.subr.mxu1 %v135_v13 }
  0x15   :  { %309 = vmatpush3.msra.mxu1 %v135_v13 }
  0xca   :  { %v293_v16 = vpop.f32.mrf.mxu0 }
  0xcb   :  { %v120_v17 = vadd.f32 %v293_v16, %v261_v15 }
  0xcc   :  { %v114_v18 = vpop.f32.mrf.mxu0 }
  0xcd   :  { %v126_v19 = vmul.f32 0.70710677, %v120_v17  ;;  %v115_v20 = vadd.f32 %v261_v15, %v114_v18  ;;  %v124_v27 = vmul.f32 0.5, %v120_v17 }
  0xcf   :  { %317 = verf.f32 %v126_v19  ;;  %v125_v21 = vmul.f32 0.70710677, %v115_v20  ;;  %v123_v25 = vmul.f32 0.5, %v115_v20 }
  0xd1   :  { %319 = verf.f32 %v125_v21 }
  0xdc   :  { %v318_v22 = vpop.eup %317 }
  0xdd   :  { %v130_v24 = vadd.f32 1.0, %v318_v22 }
  0xde   :  { %v320_v23 = vpop.eup %319 }
  0xdf   :  { %v129_v26 = vadd.f32 1.0, %v320_v23  ;;  %v132_v29 = vmul.f32 %v130_v24, %v124_v27 }
  0xe1   :  { %v131_v28 = vmul.f32 %v129_v26, %v123_v25 }
  0xe3   :  { %310 = vmatprep.mubr.msk.f32.mxu1 %vm143_vm1, %v131_v28 }
  0xe4   :  { %311 = vmatmul.mubr.msk.f32.vlgmr.msra.gmra.mxu1 %vm143_vm1, %v132_v29 }
 0x1a4   :  { %v312_v31 = vpop.f32.mrf.mxu1 }
 0x1a5   :  { %v226_v33 = vadd.f32 %v312_v31, %v134_v30 }
 0x1a6   :  { %v216_v34 = vpop.f32.mrf.mxu1 }
 0x1a7   :  { %228 = vst.msk [vmem:[#allocation2 + $0x8] sm:$0xff] %vm25_vm0, %v226_v33  ;;  %v225_v35 = vadd.f32 %v216_v34, %v133_v32 }
 0x1a9   :  { %227 = vst.msk [vmem:[#allocation2] sm:$0xff] %vm25_vm0, %v225_v35 }
 0x1ae   :  { %v233_v37 = vld [vmem:[#allocation2 + $0x8] sm:$0xff] }
 0x1af   :  { %v242_v38 = vadd.f32 %v266_v36, %v233_v37 }
 0x1b0   :  { %v232_v39 = vld [vmem:[#allocation2] sm:$0xff] }
 0x1b1   :  { %v241_v40 = vadd.f32 %v266_v36, %v232_v39  ;;  %244 = vst.msk [vmem:[#allocation3 + $0x8] sm:$0xff] %vm25_vm0, %v242_v38 }
 0x1b3   :  { %243 = vst.msk [vmem:[#allocation3] sm:$0xff] %vm25_vm0, %v241_v40 }
 0x1b4   :  { %332 = shalt.err (!%p329_p4)
}
 0x1b5   :  { %s345_s24 = smov 128   ;;  %s346_s4 = smov 8  }
 0x1b6   :  { %256 = dma.vmem_to_hbm [thread:$0]  %s251_s22, 256, %s441_s5, [#allocation4], %s345_s24, %s345_s24, %s346_s4  }
 0x1b7   :  { %341 = dma.done.wait [#allocation4], 256  }
 0x1b8   :  { %342 = vsyncadd [#allocation4], 4294967040 }
 0x1b9   :  { %260 = vsyncpa [#allocation4], 1 }

// kernel: tpu_custom_call.1
= control target key start
LH: loop header
LB: loop body
LE: loop exit
PB: predicated region body
PF: predicated region fallthrough
CT: control target
= control target key end

     0   :  { %vm25_vm0 = vcmask 261120   ;;  %s436_s0 = inlined_call_operand.vmem [shape: f32[16,32], index: 0, kind: input, shape index: {}]   ;;  %s437_s1 = inlined_call_operand.vmem [shape: f32[1,32,64], index: 1, kind: input, shape index: {}]   ;;  %s438_s2 = inlined_call_operand.vmem [shape: f32[1,1,64], index: 2, kind: input, shape index: {}]   ;;  %s439_s3 = inlined_call_operand.vmem [shape: f32[1,64,32], index: 3, kind: input, shape index: {}]   ;;  %s440_s4 = inlined_call_operand.vmem [shape: f32[1,32], index: 4, kind: input, shape index: {}]   ;;  %s441_s5 = inlined_call_operand.hbm [shape: f32[16,32], index: 5, kind: output, shape index: {}]  }
   0x1   :  { %v33_v0 = vld [vmem:[%s437_s1 + $0x18] sm:$0xff]  ;;  %v32_v1 = vld [vmem:[%s437_s1 + $0x10] sm:$0xff]  ;;  %v28_v2 = vld [vmem:[%s436_s0] sm:$0xff] }
   0x2   :  { %283 = vmatprep.subr.mxu0 %v33_v0  ;;  %v31_v3 = vld [vmem:[%s437_s1 + $0x8] sm:$0xff]  ;;  %291 = vmatprep.mubr.msk.f32.mxu0 %vm25_vm0, %v28_v2 }
   0x3   :  { %284 = vmatpush3.msra.mxu0 %v33_v0 }
   0x4   :  { %10 = vsyncpa [#allocation4], 0  ;;  %285 = vmatprep.subr.mxu0 %v32_v1  ;;  %v30_v4 = vld [vmem:[%s437_s1] sm:$0xff]  ;;  %v29_v5 = vld [vmem:[%s436_s0 + $0x8] sm:$0xff]  ;;  %v343_v14 = vmov 0.0   ;;  %vm143_vm1 = vcmask 523264  }
   0x5   :  { %286 = vmatpush3.msra.mxu0 %v32_v1  ;;  %v142_v6 = vld [vmem:[%s439_s3 + $0x38] sm:$0xff]  ;;  %v141_v7 = vld [vmem:[%s439_s3 + $0x30] sm:$0xff]  ;;  %v140_v8 = vld [vmem:[%s439_s3 + $0x28] sm:$0xff]  ;;  %27 = vst.msk [vmem:[#allocation2 + $0x8] sm:$0xff] %vm25_vm0, %v343_v14  ;;  %s344_s21 = smov [#allocation3]  }
   0x6   :  { %287 = vmatprep.subr.mxu0 %v31_v3  ;;  %294 = vmatprep.subr.mxu1 %v142_v6  ;;  %v139_v9 = vld [vmem:[%s439_s3 + $0x20] sm:$0xff]  ;;  %v138_v10 = vld [vmem:[%s439_s3 + $0x18] sm:$0xff]  ;;  %v137_v11 = vld [vmem:[%s439_s3 + $0x10] sm:$0xff]  ;;  %26 = vst.msk [vmem:[#allocation2] sm:$0xff] %vm25_vm0, %v343_v14  ;;  %s250_s22 = sshll.u32 %s344_s21, 4  ;;  %s251_s22 = int_to_ptr.vmem [resolvable:$true] %s250_s22 }
   0x7   :  { %288 = vmatpush3.msra.mxu0 %v31_v3  ;;  %295 = vmatpush3.msra.mxu1 %v142_v6  ;;  %v136_v12 = vld [vmem:[%s439_s3 + $0x8] sm:$0xff]  ;;  %v135_v13 = vld [vmem:[%s439_s3] sm:$0xff]  ;;  %s321_s23 = scalar_lea.vmem %s251_s22, 256  ;;  %p326_p1 = scmp.lt.s32.totalorder %s251_s22, %s251_s22 }
   0x8   :  { %289 = vmatprep.subr.mxu0 %v30_v4  ;;  %296 = vmatprep.subr.mxu1 %v141_v7  ;;  %v261_v15 = vld [vmem:[%s438_s2] ss:$0 sm:$0xff]  ;;  %p322_p0 = scmp.ne.s32.totalorder %s251_s22, %s321_s23  ;;  %p327_p2 = scmp.lt.s32.totalorder %s321_s23, %s321_s23 }
   0x9   :  { %290 = vmatpush3.msra.mxu0 %v30_v4  ;;  %297 = vmatpush3.msra.mxu1 %v141_v7  ;;  %v266_v36 = vld [vmem:[%s440_s4] ss:$0 sm:$0xff] }
   0xa   :  { %292 = vmatmul.mubr.msk.f32.vlgmr.msra.gmra.mxu0 %vm25_vm0, %v29_v5  ;;  %298 = vmatprep.subr.mxu1 %v140_v8  ;;  %p328_p3 = por %p327_p2, %p326_p1 }
   0xb   :  { %299 = vmatpush3.msra.mxu1 %v140_v8 }
   0xc   :  { %300 = vmatprep.subr.mxu1 %v139_v9  ;;  %v134_v30 = vld [vmem:[#allocation2 + $0x8] sm:$0xff]  ;;  %p329_p4 = pnand %p328_p3, %p322_p0 }
   0xd   :  { %301 = vmatpush3.msra.mxu1 %v139_v9  ;;  %v133_v32 = vld [vmem:[#allocation2] sm:$0xff] }
   0xe   :  { %302 = vmatprep.subr.mxu1 %v138_v10 }
   0xf   :  { %303 = vmatpush3.msra.mxu1 %v138_v10 }
  0x10   :  { %304 = vmatprep.subr.mxu1 %v137_v11 }
  0x11   :  { %305 = vmatpush3.msra.mxu1 %v137_v11 }
  0x12   :  { %306 = vmatprep.subr.mxu1 %v136_v12 }
  0x13   :  { %307 = vmatpush3.msra.mxu1 %v136_v12 }
  0x14   :  { %308 = vmatprep.subr.mxu1 %v135_v13 }
  0x15   :  { %309 = vmatpush3.msra.mxu1 %v135_v13 }
  0xca   :  { %v293_v16 = vpop.f32.mrf.mxu0 }
  0xcb   :  { %v120_v17 = vadd.f32 %v293_v16, %v261_v15 }
  0xcc   :  { %v114_v18 = vpop.f32.mrf.mxu0 }
  0xcd   :  { %v126_v19 = vmul.f32 0.70710677, %v120_v17  ;;  %v115_v20 = vadd.f32 %v261_v15, %v114_v18  ;;  %v124_v27 = vmul.f32 0.5, %v120_v17 }
  0xcf   :  { %317 = verf.f32 %v126_v19  ;;  %v125_v21 = vmul.f32 0.70710677, %v115_v20  ;;  %v123_v25 = vmul.f32 0.5, %v115_v20 }
  0xd1   :  { %319 = verf.f32 %v125_v21 }
  0xdc   :  { %v318_v22 = vpop.eup %317 }
  0xdd   :  { %v130_v24 = vadd.f32 1.0, %v318_v22 }
  0xde   :  { %v320_v23 = vpop.eup %319 }
  0xdf   :  { %v129_v26 = vadd.f32 1.0, %v320_v23  ;;  %v132_v29 = vmul.f32 %v130_v24, %v124_v27 }
  0xe1   :  { %v131_v28 = vmul.f32 %v129_v26, %v123_v25 }
  0xe3   :  { %310 = vmatprep.mubr.msk.f32.mxu1 %vm143_vm1, %v131_v28 }
  0xe4   :  { %311 = vmatmul.mubr.msk.f32.vlgmr.msra.gmra.mxu1 %vm143_vm1, %v132_v29 }
 0x1a4   :  { %v312_v31 = vpop.f32.mrf.mxu1 }
 0x1a5   :  { %v226_v33 = vadd.f32 %v312_v31, %v134_v30 }
 0x1a6   :  { %v216_v34 = vpop.f32.mrf.mxu1 }
 0x1a7   :  { %228 = vst.msk [vmem:[#allocation2 + $0x8] sm:$0xff] %vm25_vm0, %v226_v33  ;;  %v225_v35 = vadd.f32 %v216_v34, %v133_v32 }
 0x1a9   :  { %227 = vst.msk [vmem:[#allocation2] sm:$0xff] %vm25_vm0, %v225_v35 }
 0x1ae   :  { %v233_v37 = vld [vmem:[#allocation2 + $0x8] sm:$0xff] }
 0x1af   :  { %v242_v38 = vadd.f32 %v266_v36, %v233_v37 }
 0x1b0   :  { %v232_v39 = vld [vmem:[#allocation2] sm:$0xff] }
 0x1b1   :  { %v241_v40 = vadd.f32 %v266_v36, %v232_v39  ;;  %244 = vst.msk [vmem:[#allocation3 + $0x8] sm:$0xff] %vm25_vm0, %v242_v38 }
 0x1b3   :  { %243 = vst.msk [vmem:[#allocation3] sm:$0xff] %vm25_vm0, %v241_v40 }
 0x1b4   :  { %332 = shalt.err (!%p329_p4)
}
 0x1b5   :  { %s345_s24 = smov 128   ;;  %s346_s4 = smov 8  }
 0x1b6   :  { %256 = dma.vmem_to_hbm [thread:$0]  %s251_s22, 256, %s441_s5, [#allocation4], %s345_s24, %s345_s24, %s346_s4  }
 0x1b7   :  { %341 = dma.done.wait [#allocation4], 256  }
 0x1b8   :  { %342 = vsyncadd [#allocation4], 4294967040 }
 0x1b9   :  { %260 = vsyncpa [#allocation4], 1 }

</bundles_post_ra>
